<compile_context>
chip_gen: v7x
topology: tpu7x:2x2x1
jax: 0.10.0
libtpu: 0.0.40
codegen_flags: <defaults>
</compile_context>

<pallas_src>
import jax
import jax.numpy as jnp
from jax.experimental import pallas as pl
from jax.experimental.pallas import tpu as pltpu


def _round_up(n, m):
    return ((n + m - 1) // m) * m


def _make_mlp_kernel(h1p, h2p, h3p):
    """Kernel closure over the (static, 8-rounded) true layer widths."""

    def mlp_kernel(x_ref, w_ref, b_ref, o_ref):
        # x_ref: (1, TB) batch-on-lanes.  w_ref: (4, H, H).  b_ref: (4, H, 1).
        x = x_ref[...]                                                  # (1, TB)

        # fc1: Linear(1, h1) + ReLU.  K=1 contraction on the MXU (extended slot has
        # slack); bias + ReLU stay on the VPU.  Static Ref slices are free views.
        h = jnp.dot(w_ref[0, :h1p, 0:1], x, preferred_element_type=jnp.float32)
        h = jnp.maximum(h + b_ref[0, :h1p, :], 0.0)                     # (h1p, TB)

        # fc2: Linear(h1, h2) + ReLU — only the true (h2p, h1p) rows/cols of the slab.
        h = jnp.dot(w_ref[1, :h2p, :h1p], h, preferred_element_type=jnp.float32)
        h = jnp.maximum(h + b_ref[1, :h2p, :], 0.0)                     # (h2p, TB)

        # fc3: Linear(h2, h3) + ReLU.
        h = jnp.dot(w_ref[2, :h3p, :h2p], h, preferred_element_type=jnp.float32)
        h = jnp.maximum(h + b_ref[2, :h3p, :], 0.0)                     # (h3p, TB)

        # out: Linear(h3, 1) + ReLU.  N=1 matvec on the MXU; lane-dense (1, TB) store.
        o = jnp.dot(w_ref[3, 0:1, :h3p], h, preferred_element_type=jnp.float32)
        o_ref[...] = jnp.maximum(o + b_ref[3, 0:1, :], 0.0)

    return mlp_kernel


def pack_params(params, H):
    """Pack the 4 (W, b) pairs (PyTorch convention: W (out,in), b (out,)) into two
    zero-padded slabs: (4, H, H) weights and (4, H, 1) biases (3 input DMAs total)."""
    w_slab = jnp.zeros((4, H, H), jnp.float32)
    b_slab = jnp.zeros((4, H, 1), jnp.float32)
    for i, name in enumerate(("fc1", "fc2", "fc3", "out")):
        W, b = params[name]
        out_c, in_c = W.shape
        w_slab = w_slab.at[i, :out_c, :in_c].set(W)
        b_slab = b_slab.at[i, :out_c, 0].set(b)
    return w_slab, b_slab


def _pick_tile_b(B):
    """Batch tile: ~512 sweet spot (amortizes per-step overhead, stays inside the vreg
    file), 128 floor for tiny batches, and >=2 grid steps whenever the batch is big
    enough so the "parallel" axis actually shards across both v7x TensorCores."""
    if B <= 128:
        return 128
    if B <= 1024:
        return _round_up((B + 1) // 2, 128)   # exactly 2 steps, each <= 512 lanes
    return 512                                # large batch: many 512-lane steps


@jax.jit
def func_approx_net(x, params):
    """x: (B, 1) float32.  params: dict name -> (W (out,in), b (out,)) like nn.Linear.

    Computes relu(Linear(...)) for fc1, fc2, fc3, out — matching FuncApproxNet with
    act_func='ReLU' (the torch _fc_block applies the activation after every Linear,
    including the output block).
    """
    # TODO(synk): the hidden_size_2/3 == 0 layer-skipping branches of FuncApproxNet are
    # not implemented; this kernel covers the full 4-layer configuration.
    B = x.shape[0]
    h1 = params["fc1"][0].shape[0]
    h2 = params["fc2"][0].shape[0]
    h3 = params["fc3"][0].shape[0]
    # f32 slabs -> sublane multiple of 8 (would need 16 if the slabs ever become bf16).
    h1p, h2p, h3p = (_round_up(h, 8) for h in (h1, h2, h3))
    H = max(h1p, h2p, h3p)

    w_slab, b_slab = pack_params(params, H)

    tile_b = _pick_tile_b(B)
    B_pad = _round_up(B, tile_b)

    # Lane-major view of x: (B, 1) -> (1, B) is a bitcast (no HBM copy); only batches
    # that are not a multiple of the tile pay a small zero-pad copy.
    x_lanes = x.reshape(1, B)
    if B_pad != B:
        x_lanes = jnp.pad(x_lanes, ((0, 0), (0, B_pad - B)))

    grid = (B_pad // tile_b,)
    flops = 2 * B_pad * (h1p + h1p * h2p + h2p * h3p + h3p)
    bytes_accessed = 4 * (x_lanes.size + w_slab.size + b_slab.size + B_pad)

    kernel = _make_mlp_kernel(h1p, h2p, h3p)

    out = pl.pallas_call(
        kernel,
        out_shape=jax.ShapeDtypeStruct((1, B_pad), jnp.float32),
        grid=grid,
        in_specs=[
            pl.BlockSpec((1, tile_b), lambda i: (0, i)),    # x tile (lane-dense)
            pl.BlockSpec((4, H, H), lambda i: (0, 0, 0)),   # packed weights, resident
            pl.BlockSpec((4, H, 1), lambda i: (0, 0, 0)),   # packed biases, resident
        ],
        out_specs=pl.BlockSpec((1, tile_b), lambda i: (0, i)),
        compiler_params=pltpu.CompilerParams(
            dimension_semantics=("parallel",)),
        cost_estimate=pl.CostEstimate(
            flops=flops, transcendentals=0, bytes_accessed=bytes_accessed),
    )(x_lanes, w_slab, b_slab)

    if B_pad != B:
        out = out[:, :B]
    return out.reshape(B, 1)


def init_linear(key, in_c, out_c):
    # Mimic torch.nn.Linear default init: U(-1/sqrt(in), 1/sqrt(in)); W kept as (out, in).
    kw, kb = jax.random.split(key)
    bound = 1.0 / (in_c ** 0.5)
    W = jax.random.uniform(kw, (out_c, in_c), jnp.float32, minval=-bound, maxval=bound)
    b = jax.random.uniform(kb, (out_c,), jnp.float32, minval=-bound, maxval=bound)
    return W, b


if __name__ == "__main__":
    # Hyperparameters consistent with FuncApproxNet __init__ (act_func='ReLU').
    hidden_size_1, hidden_size_2, hidden_size_3 = 32, 16, 8
    batch = 8

    key = jax.random.PRNGKey(0)
    k_x, k_x2, k1, k2, k3, ko = jax.random.split(key, 6)

    params = {
        "fc1": init_linear(k1, 1, hidden_size_1),
        "fc2": init_linear(k2, hidden_size_1, hidden_size_2),
        "fc3": init_linear(k3, hidden_size_2, hidden_size_3),
        "out": init_linear(ko, hidden_size_3, 1),
    }

    # Pure-JAX reference of the same forward pass (PyTorch Linear: y = x @ W^T + b,
    # with ReLU after every Linear including the output block).
    def ref(x, params):
        h = x
        for name in ("fc1", "fc2", "fc3", "out"):
            W, b = params[name]
            h = jnp.maximum(h @ W.T + b, 0.0)
        return h

    # Small-batch path (single 128-lane tile, grid (1,)).
    x = jax.random.normal(k_x, (batch, 1), jnp.float32)
    out = jax.block_until_ready(func_approx_net(x, params))
    expected = ref(x, params)
    assert out.shape == (batch, 1)
    assert jnp.allclose(out, expected, atol=1e-5, rtol=1e-5)

    # Larger, non-tile-aligned batch: exercises the 2-step "parallel" grid (v7x TC
    # sharding) and the pad/slice boundary handling.
    x_big = jax.random.normal(k_x2, (300, 1), jnp.float32)
    out_big = jax.block_until_ready(func_approx_net(x_big, params))
    assert out_big.shape == (300, 1)
    assert jnp.allclose(out_big, ref(x_big, params), atol=1e-5, rtol=1e-5)

    print("KERNEL_OK")
</pallas_src>

<mosaic_0001>
module attributes {stable_mosaic.version = 11 : i64} {
  func.func @mlp_kernel(%arg0: i32, %arg1: memref<1x128xf32, #tpu.memory_space<vmem>>, %arg2: memref<4x32x32xf32, #tpu.memory_space<vmem>>, %arg3: memref<4x32x1xf32, #tpu.memory_space<vmem>>, %arg4: memref<1x128xf32, #tpu.memory_space<vmem>>) attributes {dimension_semantics = [#tpu.dimension_semantics<parallel>], iteration_bounds = array<i64: 1>, scalar_prefetch = 0 : i64, scratch_operands = 0 : i64, tpu.core_type = #tpu.core_type<tc>, window_params = [{transform_indices = @transform_0, window_bounds = array<i64: 1, 128>}, {pipeline_mode = #tpu.pipeline_mode<synchronous>, transform_indices = @transform_1, window_bounds = array<i64: 4, 32, 32>}, {pipeline_mode = #tpu.pipeline_mode<synchronous>, transform_indices = @transform_2, window_bounds = array<i64: 4, 32, 1>}, {transform_indices = @transform_3, window_bounds = array<i64: 1, 128>}]} {
    %c0 = arith.constant 0 : index
    %c0_0 = arith.constant 0 : index
    %0 = vector.load %arg1[%c0, %c0_0] : memref<1x128xf32, #tpu.memory_space<vmem>>, vector<1x128xf32>
    %c0_1 = arith.constant 0 : index
    %c0_2 = arith.constant 0 : index
    %c0_3 = arith.constant 0 : index
    %1 = vector.load %arg2[%c0_1, %c0_2, %c0_3] : memref<4x32x32xf32, #tpu.memory_space<vmem>>, vector<1x32x1xf32>
    %2 = vector.shape_cast %1 : vector<1x32x1xf32> to vector<32x1xf32>
    %cst = arith.constant dense<0.000000e+00> : vector<32x128xf32>
    %3 = tpu.matmul %2, %0, %cst {dimension_numbers = #tpu.dot_dimension_numbers<[1], [0], [0], [1], [0, 0, 1, 1], [], []>} : vector<32x1xf32>, vector<1x128xf32>, vector<32x128xf32> -> vector<32x128xf32>
    %c0_4 = arith.constant 0 : index
    %c0_5 = arith.constant 0 : index
    %c0_6 = arith.constant 0 : index
    %4 = vector.load %arg3[%c0_4, %c0_5, %c0_6] : memref<4x32x1xf32, #tpu.memory_space<vmem>>, vector<1x32x1xf32>
    %5 = vector.shape_cast %4 : vector<1x32x1xf32> to vector<32x1xf32>
    %6 = vector.broadcast %5 : vector<32x1xf32> to vector<32x128xf32>
    %7 = arith.addf %3, %6 : vector<32x128xf32>
    %cst_7 = arith.constant 0.000000e+00 : f32
    %8 = vector.broadcast %cst_7 : f32 to vector<32x128xf32>
    %9 = arith.maximumf %7, %8 : vector<32x128xf32>
    %c1 = arith.constant 1 : index
    %c0_8 = arith.constant 0 : index
    %c0_9 = arith.constant 0 : index
    %10 = vector.load %arg2[%c1, %c0_8, %c0_9] : memref<4x32x32xf32, #tpu.memory_space<vmem>>, vector<1x16x32xf32>
    %11 = vector.shape_cast %10 : vector<1x16x32xf32> to vector<16x32xf32>
    %cst_10 = arith.constant dense<0.000000e+00> : vector<16x128xf32>
    %12 = tpu.matmul %11, %9, %cst_10 {dimension_numbers = #tpu.dot_dimension_numbers<[1], [0], [0], [1], [0, 0, 1, 1], [], []>} : vector<16x32xf32>, vector<32x128xf32>, vector<16x128xf32> -> vector<16x128xf32>
    %c1_11 = arith.constant 1 : index
    %c0_12 = arith.constant 0 : index
    %c0_13 = arith.constant 0 : index
    %13 = vector.load %arg3[%c1_11, %c0_12, %c0_13] : memref<4x32x1xf32, #tpu.memory_space<vmem>>, vector<1x16x1xf32>
    %14 = vector.shape_cast %13 : vector<1x16x1xf32> to vector<16x1xf32>
    %15 = vector.broadcast %14 : vector<16x1xf32> to vector<16x128xf32>
    %16 = arith.addf %12, %15 : vector<16x128xf32>
    %cst_14 = arith.constant 0.000000e+00 : f32
    %17 = vector.broadcast %cst_14 : f32 to vector<16x128xf32>
    %18 = arith.maximumf %16, %17 : vector<16x128xf32>
    %c2 = arith.constant 2 : index
    %c0_15 = arith.constant 0 : index
    %c0_16 = arith.constant 0 : index
    %19 = vector.load %arg2[%c2, %c0_15, %c0_16] : memref<4x32x32xf32, #tpu.memory_space<vmem>>, vector<1x8x16xf32>
    %20 = vector.shape_cast %19 : vector<1x8x16xf32> to vector<8x16xf32>
    %cst_17 = arith.constant dense<0.000000e+00> : vector<8x128xf32>
    %21 = tpu.matmul %20, %18, %cst_17 {dimension_numbers = #tpu.dot_dimension_numbers<[1], [0], [0], [1], [0, 0, 1, 1], [], []>} : vector<8x16xf32>, vector<16x128xf32>, vector<8x128xf32> -> vector<8x128xf32>
    %c2_18 = arith.constant 2 : index
    %c0_19 = arith.constant 0 : index
    %c0_20 = arith.constant 0 : index
    %22 = vector.load %arg3[%c2_18, %c0_19, %c0_20] : memref<4x32x1xf32, #tpu.memory_space<vmem>>, vector<1x8x1xf32>
    %23 = vector.shape_cast %22 : vector<1x8x1xf32> to vector<8x1xf32>
    %24 = vector.broadcast %23 : vector<8x1xf32> to vector<8x128xf32>
    %25 = arith.addf %21, %24 : vector<8x128xf32>
    %cst_21 = arith.constant 0.000000e+00 : f32
    %26 = vector.broadcast %cst_21 : f32 to vector<8x128xf32>
    %27 = arith.maximumf %25, %26 : vector<8x128xf32>
    %c3 = arith.constant 3 : index
    %c0_22 = arith.constant 0 : index
    %c0_23 = arith.constant 0 : index
    %28 = vector.load %arg2[%c3, %c0_22, %c0_23] : memref<4x32x32xf32, #tpu.memory_space<vmem>>, vector<1x1x8xf32>
    %29 = vector.shape_cast %28 : vector<1x1x8xf32> to vector<1x8xf32>
    %cst_24 = arith.constant dense<0.000000e+00> : vector<1x128xf32>
    %30 = tpu.matmul %29, %27, %cst_24 {dimension_numbers = #tpu.dot_dimension_numbers<[1], [0], [0], [1], [0, 0, 1, 1], [], []>} : vector<1x8xf32>, vector<8x128xf32>, vector<1x128xf32> -> vector<1x128xf32>
    %c3_25 = arith.constant 3 : index
    %c0_26 = arith.constant 0 : index
    %c0_27 = arith.constant 0 : index
    %31 = vector.load %arg3[%c3_25, %c0_26, %c0_27] : memref<4x32x1xf32, #tpu.memory_space<vmem>>, vector<1x1x1xf32>
    %32 = vector.shape_cast %31 : vector<1x1x1xf32> to vector<1x1xf32>
    %33 = vector.broadcast %32 : vector<1x1xf32> to vector<1x128xf32>
    %34 = arith.addf %30, %33 : vector<1x128xf32>
    %cst_28 = arith.constant 0.000000e+00 : f32
    %35 = vector.broadcast %cst_28 : f32 to vector<1x128xf32>
    %36 = arith.maximumf %34, %35 : vector<1x128xf32>
    %c0_29 = arith.constant 0 : index
    %c0_30 = arith.constant 0 : index
    %37 = vector.load %arg4[%c0_29, %c0_30] : memref<1x128xf32, #tpu.memory_space<vmem>>, vector<1x128xf32>
    tpu.vector_store %arg4[%c0_29, %c0_30], %36 {strides = array<i32>} : memref<1x128xf32, #tpu.memory_space<vmem>>, vector<1x128xf32>,
    return
  }
  func.func @transform_0(%arg0: i32) -> (i32, i32) {
    %c0_i32 = arith.constant 0 : i32
    %c0_i32_0 = arith.constant 0 : i32
    return %c0_i32, %arg0 : i32, i32
  }
  func.func @transform_1(%arg0: i32) -> (i32, i32, i32) {
    %c0_i32 = arith.constant 0 : i32
    %c0_i32_0 = arith.constant 0 : i32
    %c0_i32_1 = arith.constant 0 : i32
    %c0_i32_2 = arith.constant 0 : i32
    return %c0_i32, %c0_i32_0, %c0_i32_1 : i32, i32, i32
  }
  func.func @transform_2(%arg0: i32) -> (i32, i32, i32) {
    %c0_i32 = arith.constant 0 : i32
    %c0_i32_0 = arith.constant 0 : i32
    %c0_i32_1 = arith.constant 0 : i32
    %c0_i32_2 = arith.constant 0 : i32
    return %c0_i32, %c0_i32_0, %c0_i32_1 : i32, i32, i32
  }
  func.func @transform_3(%arg0: i32) -> (i32, i32) {
    %c0_i32 = arith.constant 0 : i32
    %c0_i32_0 = arith.constant 0 : i32
    return %c0_i32, %arg0 : i32, i32
  }
}

</mosaic_0001>

<bundles_post_ra>
// kernel: func_approx_net.1
= control target key start
LH: loop header
LB: loop body
LE: loop exit
PB: predicated region body
PF: predicated region fallthrough
CT: control target
= control target key end

     0   :  { %vm56_vm0 = vcmask 1040384   ;;  %vm43_vm1 = vcmask 7168   ;;  %v503_v3 = vmov 0   ;;  %vm165_vm2 = vcmask 261120   ;;  %s587_s0 = inlined_call_operand.vmem [shape: f32[1,128], index: 0, kind: input, shape index: {}]   ;;  %s588_s1 = inlined_call_operand.vmem [shape: f32[4,32,32], index: 1, kind: input, shape index: {}]   ;;  %s589_s2 = inlined_call_operand.vmem [shape: f32[4,32,1], index: 2, kind: input, shape index: {}]   ;;  %s590_s3 = inlined_call_operand.vmem [shape: f32[1,128], index: 3, kind: output, shape index: {}]  }
   0x1   :  { %v14_v0 = vld [vmem:[%s587_s0] sm:$0x1]  ;;  %v16_v2 = vld [vmem:[%s588_s1 + $0x8] sm:$0xff]  ;;  %501 = vset.pattern.permute.xlu0 %v503_v3  ;;  %502 = vset.pattern.permute.xlu1 %v503_v3  ;;  %v17_v4 = vld [vmem:[%s588_s1 + $0x10] sm:$0xff]  ;;  %v504_v34 = vmov 0.0|0.0   ;;  %vm505_vm3 = vmmov 0  }
   0x2   :  { %v15_v1 = vld [vmem:[%s588_s1] sm:$0xff]  ;;  %455 = vmatprep.subr.msk.mxu0 %vm56_vm0, %v14_v0  ;;  %v21_v6 = vld [vmem:[%s589_s2 + $0x10] sm:$0xff]  ;;  %v20_v7 = vld [vmem:[%s589_s2 + $0x8] sm:$0xff]  ;;  %v506_v35 = vmov 0.0   ;;  %vm258_vm4 = vcmask 130048   ;;  %vm342_vm5 = vcmask 64512  }
   0x3   :  { %457 = vmatprep.mubr.msk.f32.mxu0 %vm43_vm1, %v15_v1  ;;  %v19_v5 = vld [vmem:[%s589_s2] sm:$0xff]  ;;  %456 = vmatpush3.msk.msra.mxu0 %vm56_vm0, %v14_v0  ;;  %v18_v8 = vld [vmem:[%s588_s1 + $0x18] sm:$0xff]  ;;  %v430_v11 = vld [vmem:[%s589_s2 + $0x28] sm:$0xff] }
   0x4   :  { %25 = vperm.xlu0 %501, %v19_v5   ;;  %458 = vmatmul.mubr.msk.f32.vlgmr.msra.gmra.mrb[0].mxu0 %vm43_vm1, %v16_v2  ;;  %v22_v9 = vld [vmem:[%s589_s2 + $0x18] sm:$0xff]  ;;  %v429_v10 = vld [vmem:[%s589_s2 + $0x20] sm:$0xff]  ;;  %v428_v33 = vld [vmem:[%s588_s1 + $0x28] sm:$0xff] }
   0x5   :  { %35 = vperm.xlu1 %502, %v21_v6   ;;  %460 = vmatprep.mubr.msk.f32.mxu0 %vm43_vm1, %v17_v4  ;;  %v434_v12 = vld [vmem:[%s589_s2 + $0x40] sm:$0xff] }
   0x6   :  { %v437_v13 = vld [vmem:[%s589_s2 + $0x60] sm:$0x1]  ;;  %494 = vmatprep.subr.bf16.mxu0 %v504_v34 }
   0x7   :  { %v427_v14 = vld [vmem:[%s588_s1 + $0x20] sm:$0xff] }
   0x8   :  { %30 = vperm.xlu0 %501, %v20_v7   ;;  %461 = vmatmul.mubr.msk.f32.gmra.mrb[2].mxu0 %vm43_vm1, %v18_v8  ;;  %v433_v45 = vld [vmem:[%s588_s1 + $0x40] sm:$0xff] }
   0x9   :  { %40 = vperm.xlu1 %502, %v22_v9   ;;  %471 = vmatprep.mubr.msk.f32.mxu1 %vm165_vm2, %v427_v14  ;;  %v436_v51 = vld [vmem:[%s588_s1 + $0x60] sm:$0x1] }
   0xa   :  { %478 = vmatprep.mubr.msk.f32.mxu0 %vm505_vm3, %v506_v35 }
   0xc   :  { %157 = vperm.xlu0 %501, %v429_v10  }
   0xd   :  { %162 = vperm.xlu1 %502, %v430_v11  }
  0x10   :  { %255 = vperm.xlu0 %501, %v434_v12  }
  0x11   :  { %339 = vperm.xlu1 %502, %v437_v13  }
  0x83   :  { %v26_v15 = vpop.permute.xlu0 %25 }
  0x84   :  { %v36_v16 = vpop.permute.xlu1 %35 }
  0x87   :  { %v31_v17 = vpop.permute.xlu0 %30 }
  0x88   :  { %v41_v23 = vpop.permute.xlu1 %40 }
  0x8b   :  { %v158_v38 = vpop.permute.xlu0 %157 }
  0x8c   :  { %v163_v36 = vpop.permute.xlu1 %162 }
  0x8f   :  { %v256_v46 = vpop.permute.xlu0 %255 }
  0x90   :  { %v340_v52 = vpop.permute.xlu1 %339 }
  0xd7   :  { %v459_v18 = vpop.f32.mrb[0].mxu0 }
  0xd8   :  { %v132_v19 = vadd.f32 %v459_v18, %v31_v17  ;;  %v126_v20 = vpop.f32.mrb[1].mxu0 }
  0xd9   :  { %v127_v21 = vadd.f32 %v126_v20, %v26_v15 }
  0xda   :  { %v146_v22 = vmax.f32 %v132_v19, 0.0 }
  0xdb   :  { %v145_v24 = vmax.f32 %v127_v21, 0.0  ;;  %v462_v25 = vpop.f32.mrb[2].mxu0 }
  0xdc   :  { %v142_v26 = vadd.f32 %v462_v25, %v41_v23  ;;  %v136_v27 = vpop.f32.mrb[3].mxu0 }
  0xdd   :  { %v137_v28 = vadd.f32 %v136_v27, %v36_v16  ;;  %v486_v29 = vpack.c.bf16 %v146_v22, %v145_v24 }
  0xde   :  { %v148_v30 = vmax.f32 %v142_v26, 0.0 }
  0xdf   :  { %v147_v31 = vmax.f32 %v137_v28, 0.0  ;;  %487 = vmatprep.subr.bf16.mxu1 %v486_v29 }
  0xe0   :  { %489 = vmatpush3.bf16.msra.mxu1 %v486_v29 }
  0xe1   :  { %v490_v32 = vpack.c.bf16 %v148_v30, %v147_v31 }
  0xe3   :  { %491 = vmatprep.subr.bf16.mxu1 %v490_v32 }
  0xe4   :  { %493 = vmatpush3.bf16.msra.mxu1 %v490_v32 }
  0xe5   :  { %481 = vmatprep.subr.mxu1 %v506_v35 }
  0xe7   :  { %472 = vmatmul.mubr.msk.f32.vlgmr.msra.gmra.mrb[0].mxu1 %vm165_vm2, %v428_v33 }
  0xe8   :  { %483 = vmatprep.mubr.msk.f32.mxu1 %vm505_vm3, %v506_v35 }
 0x1ba   :  { %v473_v37 = vpop.f32.mrb[0].mxu1 }
 0x1bb   :  { %v244_v39 = vadd.f32 %v473_v37, %v163_v36  ;;  %v238_v40 = vpop.f32.mrb[1].mxu1 }
 0x1bc   :  { %v239_v41 = vadd.f32 %v238_v40, %v158_v38 }
 0x1bd   :  { %v248_v42 = vmax.f32 %v244_v39, 0.0 }
 0x1be   :  { %v247_v43 = vmax.f32 %v239_v41, 0.0 }
 0x1c0   :  { %v495_v44 = vpack.c.bf16 %v248_v42, %v247_v43 }
 0x1c2   :  { %496 = vmatpush3.bf16.msra.mxu0 %v495_v44 }
 0x1c5   :  { %479 = vmatmul.mubr.msk.f32.vlgmr.msra.gmra.mrb[4].mxu0 %vm258_vm4, %v433_v45 }
 0x298   :  { %v328_v47 = vpop.f32.mrb[4].mxu0 }
 0x299   :  { %v329_v48 = vadd.f32 %v328_v47, %v256_v46  ;;  %v480_v49 = vpop.f32.mrb[5].mxu0 }
 0x29b   :  { %v332_v50 = vmax.f32 %v329_v48, 0.0 }
 0x29d   :  { %482 = vmatpush3.msra.mxu1 %v332_v50 }
 0x29e   :  { %484 = vmatmul.mubr.msk.f32.vlgmr.msra.gmra.mrb[2].mxu1 %vm342_vm5, %v436_v51 }
 0x371   :  { %v412_v53 = vpop.f32.mrb[2].mxu1 }
 0x372   :  { %v413_v54 = vadd.f32 %v412_v53, %v340_v52  ;;  %v485_v55 = vpop.f32.mrb[3].mxu1 }
 0x374   :  { %v416_v56 = vmax.f32 %v413_v54, 0.0 }
 0x376   :  { %417 = vst [vmem:[%s590_s3] sm:$0x1] %v416_v56 }

</bundles_post_ra>
